<compile_context>
chip_gen: v7x
topology: tpu7x:2x2x1
jax: 0.10.0
libtpu: 0.0.40
codegen_flags: <defaults>
</compile_context>

<pallas_src>
import jax
import jax.numpy as jnp
from jax.experimental import pallas as pl
from jax.experimental.pallas import tpu as pltpu

EPS = 1e-5
MIB = 1024 * 1024
TILED_VMEM_LIMIT = 32 * MIB            # legal scoped VMEM on v5e / v6e / v7x
TARGET_BLOCK_ELEMS = 512 * 1024        # ~2 MiB f32 (1 MiB bf16) streamed blocks


def _round_up(a, m):
    return ((a + m - 1) // m) * m


def _vmem_capacity_bytes():
    """Physical per-core VMEM; conservative fallback is safe on every generation."""
    try:
        info = pltpu.get_tpu_info()
        for attr in ("vmem_capacity_bytes", "vmem_size_bytes", "vmem_bytes"):
            v = getattr(info, attr, None)
            if v:
                return int(v)
    except Exception:
        pass
    return 64 * MIB                    # v7x per-TC size; v5e/v6e have 128 MiB


def _to_slab(x_flat, row_multiple):
    """Reshape (and only if unavoidable, minimally zero-pad) to a lane-dense 2-D slab."""
    t = x_flat.shape[0]
    # Pad-free layouts first: reshaping a contiguous array costs nothing.
    for cols in (1024, 512, 256, 128):
        if t % cols == 0 and (t // cols) % row_multiple == 0:
            rows = t // cols
            return x_flat.reshape(rows, cols), rows, cols, False
    # Ragged fallback: pad rows only to the dtype tile (not to the block size).
    # Zero padding contributes nothing to sum / sum-of-squares.
    cols = 512 if t >= 512 * row_multiple else 128
    rows = _round_up(pl.cdiv(t, cols), row_multiple)
    x2 = jnp.pad(x_flat, (0, rows * cols - t)).reshape(rows, cols)
    return x2, rows, cols, True


# ----------------------------------------------------------------------------
# Resident fast path: whole slab in VMEM, one kernel, 2 HBM passes.
# ----------------------------------------------------------------------------
def _bn_resident(x2, rows, cols, params, inv_n, eps, vmem_limit):
    chunk_rows = min(512, rows)                  # ~1 MiB f32 working chunk
    nfull = rows // chunk_rows
    rem = rows - nfull * chunk_rows              # static; multiple of the dtype tile

    def kernel(p_ref, x_ref, o_ref):
        # ---- pass A (in VMEM): accumulate sum / sumsq as (1,1) vectors ----
        def add_stats(xc, s, q):
            xf = xc.astype(jnp.float32)
            return (s + jnp.sum(xf, keepdims=True),
                    q + jnp.sum(xf * xf, keepdims=True))

        def stat_body(i, carry):
            r0 = pl.multiple_of(i * chunk_rows, chunk_rows)
            return add_stats(x_ref[pl.ds(r0, chunk_rows), :], *carry)

        zero = jnp.zeros((1, 1), jnp.float32)
        s, q = jax.lax.fori_loop(0, nfull, stat_body, (zero, zero))
        if rem:
            s, q = add_stats(x_ref[pl.ds(nfull * chunk_rows, rem), :], s, q)

        mean = s * inv_n
        var = jnp.maximum(q * inv_n - mean * mean, 0.0)   # clamp: cancellation safety
        inv_std = jax.lax.rsqrt(var + eps)                # EUP slot, (1,1) vector op
        scale = inv_std * p_ref[0]                        # gamma
        shift = p_ref[1] - mean * scale                   # beta

        # ---- pass B (in VMEM): y = x * scale + shift ----
        def write(r0, nrows):
            xf = x_ref[pl.ds(r0, nrows), :].astype(jnp.float32)
            o_ref[pl.ds(r0, nrows), :] = (xf * scale + shift).astype(o_ref.dtype)

        def norm_body(i, carry):
            write(pl.multiple_of(i * chunk_rows, chunk_rows), chunk_rows)
            return carry

        jax.lax.fori_loop(0, nfull, norm_body, 0)
        if rem:
            write(nfull * chunk_rows, rem)

    return pl.pallas_call(
        kernel,
        out_shape=jax.ShapeDtypeStruct((rows, cols), x2.dtype),
        in_specs=[
            pl.BlockSpec(memory_space=pltpu.MemorySpace.SMEM),   # (gamma, beta)
            pl.BlockSpec(memory_space=pltpu.MemorySpace.VMEM),   # whole slab, single-buffered
        ],
        out_specs=pl.BlockSpec(memory_space=pltpu.MemorySpace.VMEM),
        compiler_params=pltpu.CompilerParams(vmem_limit_bytes=vmem_limit),
    )(params, x2)


# ----------------------------------------------------------------------------
# Tiled two-pass path: pipelined reduce (per-core accumulator), then normalize.
# ----------------------------------------------------------------------------
def _bn_tiled(x2, rows, cols, gamma, beta, inv_n, eps, block_rows=None):
    if block_rows is None:
        block_rows = max(8, TARGET_BLOCK_ELEMS // cols)
    block_rows = min(block_rows, rows)
    nt = pl.cdiv(rows, block_rows)
    ncores = 2 if nt % 2 == 0 else 1          # megacore split on v7x; harmless on 1-TC chips
    inner_nt = nt // ncores
    need_mask = (nt * block_rows != rows)     # last streamed block is partial

    # ---- pass 1: per-core partial sum / sumsq via resident accumulator ----
    def reduce_kernel(x_ref, sum_ref, sq_ref):
        c = pl.program_id(0)
        j = pl.program_id(1)

        @pl.when(j == 0)
        def _():
            sum_ref[...] = jnp.zeros_like(sum_ref)
            sq_ref[...] = jnp.zeros_like(sq_ref)

        x = x_ref[...].astype(jnp.float32)
        if need_mask:
            row0 = (c * inner_nt + j) * block_rows
            rid = row0 + jax.lax.broadcasted_iota(jnp.int32, x.shape, 0)
            x = jnp.where(rid < rows, x, 0.0)
        sum_ref[...] = sum_ref[...] + jnp.sum(x)
        sq_ref[...] = sq_ref[...] + jnp.sum(x * x)

    partial_sum, partial_sq = pl.pallas_call(
        reduce_kernel,
        out_shape=(jax.ShapeDtypeStruct((ncores, 8, 128), jnp.float32),
                   jax.ShapeDtypeStruct((ncores, 8, 128), jnp.float32)),
        grid_spec=pltpu.PrefetchScalarGridSpec(
            num_scalar_prefetch=0,
            grid=(ncores, inner_nt),
            in_specs=[pl.BlockSpec((block_rows, cols),
                                   lambda c, j: (c * inner_nt + j, 0))],
            out_specs=(pl.BlockSpec((1, 8, 128), lambda c, j: (c, 0, 0)),
                       pl.BlockSpec((1, 8, 128), lambda c, j: (c, 0, 0))),
        ),
        compiler_params=pltpu.CompilerParams(
            dimension_semantics=("parallel", "arbitrary"),
            vmem_limit_bytes=TILED_VMEM_LIMIT),
    )(x2)

    # Tiny combine + scalar chain (operates on `ncores` scalars only).
    total_sum = jnp.sum(partial_sum[:, 0, 0])
    total_sq = jnp.sum(partial_sq[:, 0, 0])
    mean = total_sum * inv_n
    var = jnp.maximum(total_sq * inv_n - mean * mean, 0.0)   # biased var, clamped
    inv_std = jax.lax.rsqrt(var + eps)
    scale = inv_std * gamma
    shift = beta - mean * scale
    ss = jnp.stack([scale, shift]).astype(jnp.float32)

    # ---- pass 2: y = x * scale + shift (folded affine), streamed ----
    def normalize_kernel(ss_ref, x_ref, o_ref):
        o_ref[...] = (x_ref[...].astype(jnp.float32) * ss_ref[0]
                      + ss_ref[1]).astype(o_ref.dtype)

    y2 = pl.pallas_call(
        normalize_kernel,
        out_shape=jax.ShapeDtypeStruct((rows, cols), x2.dtype),
        grid_spec=pltpu.PrefetchScalarGridSpec(
            num_scalar_prefetch=0,
            grid=(nt,),
            in_specs=[pl.BlockSpec(memory_space=pltpu.MemorySpace.SMEM),
                      pl.BlockSpec((block_rows, cols), lambda i: (i, 0))],
            out_specs=pl.BlockSpec((block_rows, cols), lambda i: (i, 0)),
        ),
        compiler_params=pltpu.CompilerParams(
            dimension_semantics=("parallel",),
            vmem_limit_bytes=TILED_VMEM_LIMIT),
    )(ss, x2)
    return y2


# ----------------------------------------------------------------------------
# Public wrapper (matches WrappedBatchNorm.forward: nn.BatchNorm2d(1), training).
# ----------------------------------------------------------------------------
def wrapped_batch_norm(x, weight, bias, eps=EPS, force_tiled=False, block_rows=None):
    """x: (N, 1, H, W); weight/bias: (1,). Returns training-mode BN forward output."""
    N, C, H, W = x.shape
    assert C == 1, "WrappedBatchNorm uses nn.BatchNorm2d(1)"
    t = N * C * H * W
    inv_n = 1.0 / float(t)
    row_multiple = max(8, 32 // jnp.dtype(x.dtype).itemsize)   # (8,128) f32 / (16,128) bf16
    x2, rows, cols, padded = _to_slab(x.reshape(t), row_multiple)

    slab_bytes = rows * cols * x2.dtype.itemsize
    vmem_cap = _vmem_capacity_bytes()
    resident_cutoff = (vmem_cap * 34) // 100       # ~22 MiB on v7x, ~43 MiB on v5e/v6e

    if slab_bytes <= resident_cutoff and not force_tiled:
        params = jnp.stack([weight[0], bias[0]]).astype(jnp.float32)
        vmem_limit = int(min(vmem_cap - 4 * MIB, 2 * slab_bytes + 16 * MIB))
        y2 = _bn_resident(x2, rows, cols, params, inv_n, eps, vmem_limit)
    else:
        y2 = _bn_tiled(x2, rows, cols, weight[0], bias[0], inv_n, eps, block_rows)

    if padded:
        return y2.reshape(rows * cols)[:t].reshape(N, C, H, W)
    return y2.reshape(N, C, H, W)


if __name__ == "__main__":
    key = jax.random.PRNGKey(0)
    k1, k2, k3 = jax.random.split(key, 3)

    weight = jnp.array([1.5], dtype=jnp.float32)
    bias = jnp.array([-0.25], dtype=jnp.float32)

    def reference(x, w, b, eps=EPS):
        mean = jnp.mean(x)
        var = jnp.mean((x - mean) ** 2)
        return (x - mean) * jax.lax.rsqrt(var + eps) * w[0] + b[0]

    # Shape implied by the module (BatchNorm2d(1)): NCHW with C == 1.
    x_small = jax.random.normal(k1, (2, 1, 16, 16), dtype=jnp.float32)
    out = jax.block_until_ready(wrapped_batch_norm(x_small, weight, bias))
    assert jnp.allclose(out, reference(x_small, weight, bias), atol=1e-5, rtol=1e-5), \
        "resident path mismatch"

    # Exercise the tiled path (pad-free layout, 2-core grid, masked partial block).
    x_med = jax.random.normal(k2, (2, 1, 32, 48), dtype=jnp.float32)
    out_t = jax.block_until_ready(
        wrapped_batch_norm(x_med, weight, bias, force_tiled=True, block_rows=16))
    assert jnp.allclose(out_t, reference(x_med, weight, bias), atol=1e-5, rtol=1e-5), \
        "tiled path mismatch"

    # Ragged size -> minimal-pad fallback on the resident path.
    x_rag = jax.random.normal(k3, (2, 1, 24, 40), dtype=jnp.float32)
    out_r = jax.block_until_ready(wrapped_batch_norm(x_rag, weight, bias))
    assert jnp.allclose(out_r, reference(x_rag, weight, bias), atol=1e-5, rtol=1e-5), \
        "ragged path mismatch"

    print("KERNEL_OK")
</pallas_src>

<mosaic_0001>
module attributes {stable_mosaic.version = 11 : i64} {
  func.func @kernel(%arg0: memref<2xf32, #tpu.memory_space<smem>>, %arg1: memref<8x128xf32, #tpu.memory_space<vmem>>, %arg2: memref<8x128xf32, #tpu.memory_space<vmem>>) attributes {dimension_semantics = [], scalar_prefetch = 0 : i64, scratch_operands = 0 : i64, tpu.core_type = #tpu.core_type<tc>} {
    %cst = arith.constant 0.000000e+00 : f32
    %0 = vector.broadcast %cst : f32 to vector<1x1xf32>
    %c0_i32 = arith.constant 0 : i32
    %c8_i32 = arith.constant 8 : i32
    %1 = arith.muli %c0_i32, %c8_i32 : i32
    %2 = tpu.assume_multiple %1, 8 : i32
    %3 = arith.index_cast %2 : i32 to index
    %c0 = arith.constant 0 : index
    %4 = vector.load %arg1[%3, %c0] : memref<8x128xf32, #tpu.memory_space<vmem>>, vector<8x128xf32>
    %5 = vector.shape_cast %4 : vector<8x128xf32> to vector<1x8x128xf32>
    %cst_0 = arith.constant dense<0.000000e+00> : vector<1xf32>
    %6 = vector.multi_reduction <add>, %5, %cst_0 [1, 2] : vector<1x8x128xf32> to vector<1xf32>
    %7 = vector.shape_cast %6 : vector<1xf32> to vector<1x1x1xf32>
    %8 = vector.extract %7[0, 0, 0] : f32 from vector<1x1x1xf32>
    %9 = vector.broadcast %8 : f32 to vector<1x1xf32>
    %10 = arith.addf %0, %9 : vector<1x1xf32>
    %11 = arith.mulf %4, %4 : vector<8x128xf32>
    %12 = vector.shape_cast %11 : vector<8x128xf32> to vector<1x8x128xf32>
    %cst_1 = arith.constant dense<0.000000e+00> : vector<1xf32>
    %13 = vector.multi_reduction <add>, %12, %cst_1 [1, 2] : vector<1x8x128xf32> to vector<1xf32>
    %14 = vector.shape_cast %13 : vector<1xf32> to vector<1x1x1xf32>
    %15 = vector.extract %14[0, 0, 0] : f32 from vector<1x1x1xf32>
    %16 = vector.broadcast %15 : f32 to vector<1x1xf32>
    %17 = arith.addf %0, %16 : vector<1x1xf32>
    %c1_i32 = arith.constant 1 : i32
    %cst_2 = arith.constant 0.001953125 : f32
    %18 = vector.broadcast %cst_2 : f32 to vector<1x1xf32>
    %19 = arith.mulf %10, %18 : vector<1x1xf32>
    %cst_3 = arith.constant 0.001953125 : f32
    %20 = vector.broadcast %cst_3 : f32 to vector<1x1xf32>
    %21 = arith.mulf %17, %20 : vector<1x1xf32>
    %22 = arith.mulf %19, %19 : vector<1x1xf32>
    %23 = arith.subf %21, %22 : vector<1x1xf32>
    %cst_4 = arith.constant 0.000000e+00 : f32
    %24 = vector.broadcast %cst_4 : f32 to vector<1x1xf32>
    %25 = arith.maximumf %23, %24 : vector<1x1xf32>
    %cst_5 = arith.constant 9.99999974E-6 : f32
    %26 = vector.broadcast %cst_5 : f32 to vector<1x1xf32>
    %27 = arith.addf %25, %26 : vector<1x1xf32>
    %28 = math.rsqrt %27 : vector<1x1xf32>
    %c0_6 = arith.constant 0 : index
    %29 = memref.load %arg0[%c0_6] : memref<2xf32, #tpu.memory_space<smem>>
    %30 = vector.broadcast %29 : f32 to vector<1x1xf32>
    %31 = arith.mulf %28, %30 : vector<1x1xf32>
    %c1 = arith.constant 1 : index
    %32 = memref.load %arg0[%c1] : memref<2xf32, #tpu.memory_space<smem>>
    %33 = arith.mulf %19, %31 : vector<1x1xf32>
    %34 = vector.broadcast %32 : f32 to vector<1x1xf32>
    %35 = arith.subf %34, %33 : vector<1x1xf32>
    %c0_i32_7 = arith.constant 0 : i32
    %c8_i32_8 = arith.constant 8 : i32
    %36 = arith.muli %c0_i32_7, %c8_i32_8 : i32
    %37 = tpu.assume_multiple %36, 8 : i32
    %38 = arith.index_cast %37 : i32 to index
    %c0_9 = arith.constant 0 : index
    %39 = vector.load %arg1[%38, %c0_9] : memref<8x128xf32, #tpu.memory_space<vmem>>, vector<8x128xf32>
    %40 = vector.broadcast %31 : vector<1x1xf32> to vector<8x128xf32>
    %41 = arith.mulf %39, %40 : vector<8x128xf32>
    %42 = vector.broadcast %35 : vector<1x1xf32> to vector<8x128xf32>
    %43 = arith.addf %41, %42 : vector<8x128xf32>
    %44 = arith.index_cast %37 : i32 to index
    %c0_10 = arith.constant 0 : index
    %45 = vector.load %arg2[%44, %c0_10] : memref<8x128xf32, #tpu.memory_space<vmem>>, vector<8x128xf32>
    tpu.vector_store %arg2[%44, %c0_10], %43 {strides = array<i32>} : memref<8x128xf32, #tpu.memory_space<vmem>>, vector<8x128xf32>,
    %c1_i32_11 = arith.constant 1 : i32
    return
  }
}

</mosaic_0001>

<bundles_post_ra>
// kernel: tpu_custom_call.1
= control target key start
LH: loop header
LB: loop body
LE: loop exit
PB: predicated region body
PF: predicated region fallthrough
CT: control target
= control target key end

     0   :  { %7 = vsyncpa [#allocation5], 0  ;;  %s216_s0 = inlined_call_operand.hbm [shape: f32[2], index: 0, kind: input, shape index: {}]   ;;  %s217_s1 = inlined_call_operand.hbm [shape: f32[8,128], index: 1, kind: input, shape index: {}]   ;;  %s218_s2 = inlined_call_operand.hbm [shape: f32[8,128], index: 2, kind: output, shape index: {}]  }
   0x1   :  { %8 = vsyncpa [#allocation3], 0 }
   0x2   :  { %9 = vsyncpa [#allocation4], 0  ;;  %s102_s11 = scalar_lea.hbm %s216_s0, 16 }
   0x3   :  { %p103_p0 = scmp.ne.s32.totalorder %s216_s0, %s102_s11  ;;  %p106_p1 = scmp.lt.u32.totalorder %s102_s11, %s216_s0 }
   0x5   :  { %p108_p2 = pnand %p106_p1, %p103_p0 }
   0x7   :  { %111 = shalt.err (!%p108_p2)
}
   0x8   :  { %s162_s16 = smov [#allocation2]   ;;  %s163_s19 = smov [#allocation6]  }
   0x9   :  { %17 = dma.hbm_to_smem %s216_s0, 16, %s162_s16, [#allocation5]  }
   0xa   :  { %s24_s20 = sshll.u32 %s163_s19, 4  ;;  %s112_s23 = scalar_lea.hbm %s217_s1, 128  ;;  %s25_s20 = int_to_ptr.vmem [resolvable:$true] %s24_s20 }
   0xb   :  { %p113_p3 = scmp.ne.s32.totalorder %s217_s1, %s112_s23  ;;  %p116_p4 = scmp.lt.u32.totalorder %s112_s23, %s217_s1 }
   0xd   :  { %p118_p5 = pnand %p116_p4, %p113_p3 }
   0xf   :  { %121 = shalt.err (!%p118_p5)
}
  0x10   :  { %s122_s28 = scalar_lea.vmem %s25_s20, 128  ;;  %p127_p7 = scmp.lt.s32.totalorder %s25_s20, %s25_s20 }
  0x11   :  { %p123_p6 = scmp.ne.s32.totalorder %s25_s20, %s122_s28  ;;  %p128_p8 = scmp.lt.s32.totalorder %s122_s28, %s122_s28 }
  0x13   :  { %p129_p9 = por %p128_p8, %p127_p7 }
  0x15   :  { %p130_p10 = pnand %p129_p9, %p123_p6 }
  0x17   :  { %133 = shalt.err (!%p130_p10)
}
  0x18   :  { %27 = dma.hbm_to_vmem [thread:$0]  %s217_s1, 128, %s25_s20, [#allocation3]  }
  0x19   :  { %156 = dma.done.wait [#allocation5], 16  }
  0x1a   :  { %157 = vsyncadd [#allocation5], 4294967280 }
  0x1b   :  { %158 = dma.done.wait [#allocation3], 128  }
  0x1c   :  { %159 = vsyncadd [#allocation3], 4294967168 }
  0x1d   :  { %34 = sfence }
  0x1e   :  { %v35_v0 = vld [vmem:[#allocation6] sm:$0xff]  ;;  %s66_s3 = sld [smem:[#allocation2]]  ;;  %s92_s4 = sld [smem:[#allocation2 + $0x1]] }
  0x1f   :  { %36 = vadd.xlane.f32.xlu0 %v35_v0  ;;  %v47_v1 = vmul.f32 %v35_v0, %v35_v0  ;;  %s164_s5 = smov [#allocation7]  }
  0x20   :  { %s82_s6 = sshll.u32 %s164_s5, 4  ;;  %s83_s6 = int_to_ptr.vmem [resolvable:$true] %s82_s6 }
  0x21   :  { %s134_s7 = scalar_lea.vmem %s83_s6, 128  ;;  %p139_p12 = scmp.lt.s32.totalorder %s83_s6, %s83_s6 }
  0x22   :  { %p135_p11 = scmp.ne.s32.totalorder %s83_s6, %s134_s7  ;;  %p140_p13 = scmp.lt.s32.totalorder %s134_s7, %s134_s7 }
  0x23   :  { %48 = vadd.xlane.f32.xlu0 %v47_v1 }
  0x24   :  { %v67_v24 = vstv %s66_s3  ;;  %v71_v27 = vstv %s92_s4  ;;  %p141_p0 = por %p140_p13, %p139_p12 }
  0x26   :  { %p142_p1 = pnand %p141_p0, %p135_p11 }
  0xac   :  { %v37_v2 = vpop.xlane.xlu0 %36 }
  0xad   :  { %v38_v3 = vrot.slane %v37_v2, 4 }
  0xaf   :  { %v39_v4 = vadd.f32 %v38_v3, %v37_v2 }
  0xb0   :  { %v49_v5 = vpop.xlane.xlu0 %48 }
  0xb1   :  { %v40_v6 = vrot.slane %v39_v4, 2  ;;  %v50_v7 = vrot.slane %v49_v5, 4 }
  0xb3   :  { %v51_v8 = vadd.f32 %v50_v7, %v49_v5  ;;  %v41_v9 = vadd.f32 %v40_v6, %v39_v4 }
  0xb5   :  { %v52_v10 = vrot.slane %v51_v8, 2  ;;  %v42_v11 = vrot.slane %v41_v9, 1 }
  0xb7   :  { %v53_v12 = vadd.f32 %v52_v10, %v51_v8  ;;  %v43_v13 = vadd.f32 %v42_v11, %v41_v9 }
  0xb9   :  { %93 = vpush %v43_v13  ;;  %v54_v14 = vrot.slane %v53_v12, 1 }
  0xbb   :  { %v55_v15 = vadd.f32 %v54_v14, %v53_v12 }
  0xbd   :  { %95 = vpush %v55_v15 }
  0xea   :  { %s94_s1 = spop %93 }
  0xeb   :  { %v45_v16 = vstv %s94_s1 }
  0xec   :  { %v59_v17 = vmul.f32 0.001953125, %v45_v16 }
  0xee   :  { %s96_s30 = spop %95  ;;  %v61_v19 = vmul.f32 %v59_v17, %v59_v17 }
  0xef   :  { %v57_v18 = vstv %s96_s30 }
  0xf0   :  { %v60_v20 = vmul.f32 0.001953125, %v57_v18 }
  0xf2   :  { %v62_v21 = vsub.f32 %v60_v20, %v61_v19 }
  0xf4   :  { %v63_v22 = vmax.f32 %v62_v21, 0.0 }
  0xf6   :  { %v64_v23 = vadd.f32 1e-05, %v63_v22 }
  0xf8   :  { %100 = vrsqrt.f32 %v64_v23 }
 0x102   :  { %v101_v25 = vpop.eup %100 }
 0x103   :  { %v68_v26 = vmul.f32 %v101_v25, %v67_v24 }
 0x105   :  { %v70_v28 = vmul.f32 %v68_v26, %v59_v17  ;;  %v73_v30 = vmul.f32 %v68_v26, %v35_v0 }
 0x107   :  { %v72_v29 = vsub.f32 %v71_v27, %v70_v28 }
 0x109   :  { %v74_v31 = vadd.f32 %v73_v30, %v72_v29 }
 0x10b   :  { %75 = vst [vmem:[#allocation7] sm:$0xff] %v74_v31 }
 0x10c   :  { %145 = shalt.err (!%p142_p1)
}
 0x10d   :  { %s146_s10 = scalar_lea.hbm %s218_s2, 128 }
 0x10e   :  { %p147_p2 = scmp.ne.s32.totalorder %s218_s2, %s146_s10  ;;  %p150_p3 = scmp.lt.u32.totalorder %s146_s10, %s218_s2 }
 0x110   :  { %p152_p4 = pnand %p150_p3, %p147_p2 }
 0x112   :  { %155 = shalt.err (!%p152_p4)
}
 0x113   :  { %85 = dma.vmem_to_hbm [thread:$0]  %s83_s6, 128, %s218_s2, [#allocation4]  }
 0x114   :  { %160 = dma.done.wait [#allocation4], 128  }
 0x115   :  { %161 = vsyncadd [#allocation4], 4294967168 }
 0x116   :  { %89 = vsyncpa [#allocation3], 1 }
 0x117   :  { %90 = vsyncpa [#allocation4], 1 }
 0x118   :  { %91 = vsyncpa [#allocation5], 1 }

</bundles_post_ra>
